<compile_context>
chip_gen: v6e
topology: v6e:2x2x1
jax: 0.10.0
libtpu: 0.0.40
codegen_flags: <defaults>
</compile_context>

<pallas_src>
import functools

import jax
import jax.numpy as jnp
from jax import lax
from jax.experimental import pallas as pl
from jax.experimental.pallas import tpu as pltpu

EPS = 1e-5


def _cdiv(a, b):
    return -(-a // b)


def _round_up(x, m):
    return _cdiv(x, m) * m


def _spatial_tiling(hw_half, cap=2048):
    """Packed rows per tile (multiple of 8, <= cap) and number of spatial tiles."""
    ns = max(1, _cdiv(hw_half, cap))
    tp = _round_up(_cdiv(hw_half, ns), 8)
    return tp, ns


# ---------------------------------------------------------------------------
# Pass 1: per-batch channel sums / sum-of-squares of the 1x1-conv output.
# ---------------------------------------------------------------------------
def _reduce_kernel(xy_ref, w1_ref, bsum_ref, bssq_ref):
    s = pl.program_id(1)

    @pl.when(s == 0)
    def _():
        bsum_ref[...] = jnp.zeros_like(bsum_ref)
        bssq_ref[...] = jnp.zeros_like(bssq_ref)

    # (TP, 4C) bf16 @ (4C, 2C) bf16 -> (TP, 2C) f32 (packed pixel pairs).
    h = jnp.dot(xy_ref[...], w1_ref[...], preferred_element_type=jnp.float32)
    bsum_ref[...] += jnp.sum(h, axis=0)[None, None, :]
    bssq_ref[...] += jnp.sum(h * h, axis=0)[None, None, :]


# ---------------------------------------------------------------------------
# Pass 2: tiny tail -- BN affine, SE, control_v1 / bn_v1 / relu / softmax, logits.
# ---------------------------------------------------------------------------
def _tail_kernel(bsum_ref, bssq_ref, g1_ref, be1_ref, wse1_ref, wse2_ref,
                 wc_ref, bc_ref, gv_ref, bv_ref, lx_ref, ly_ref,
                 ascale_ref, cscale_ref, logit_ref, *, n_rows, hw):
    C = g1_ref.shape[1]
    # Fold the packed (even/odd pixel) halves back onto the C channels.
    bsum = bsum_ref[:, 0, :C] + bsum_ref[:, 0, C:]              # (B, C)
    bssq = bssq_ref[:, 0, :C] + bssq_ref[:, 0, C:]              # (B, C)

    # bn1: training-mode batch statistics over all N*H*W rows (biased var).
    mean = jnp.sum(bsum, axis=0, keepdims=True) * (1.0 / n_rows)      # (1, C)
    var = jnp.sum(bssq, axis=0, keepdims=True) * (1.0 / n_rows) - mean * mean
    a = g1_ref[...] * lax.rsqrt(var + EPS)                      # (1, C)
    c = be1_ref[...] - a * mean                                 # (1, C)

    # SE block: global average pool of bn1 output -> fc -> relu -> fc -> sigmoid.
    pooled = a * (bsum * (1.0 / hw)) + c                        # (B, C) = pool(bn1(h))
    se = jnp.dot(pooled, wse1_ref[...], preferred_element_type=jnp.float32)
    se = jnp.maximum(se, 0.0)
    se = jnp.dot(se, wse2_ref[...], preferred_element_type=jnp.float32)
    se = 1.0 / (1.0 + jnp.exp(-se))                             # (B, C)

    # control_v1 -> bn_v1 -> relu -> softmax on pooled SE output.
    pooled_fc = se * pooled                                     # (B, C) = pool(feasc)
    feas = jnp.dot(pooled_fc, wc_ref[...],
                   preferred_element_type=jnp.float32) + bc_ref[...]   # (B, 2)
    mv = jnp.mean(feas, axis=0, keepdims=True)
    vv = jnp.mean((feas - mv) ** 2, axis=0, keepdims=True)
    feas = gv_ref[...] * (feas - mv) * lax.rsqrt(vv + EPS) + bv_ref[...]
    feas = jnp.maximum(feas, 0.0)
    m = jnp.max(feas, axis=1, keepdims=True)
    e = jnp.exp(feas - m)
    feas = e / jnp.sum(e, axis=1, keepdims=True)

    logit_ref[...] = feas[:, 0:1] * lx_ref[...] + feas[:, 1:2] * ly_ref[...]

    # Per-batch fused affine for the apply pass (feasc = A*h + Cc), duplicated
    # across both packed halves -> lane-dense (B, 1, 2C).
    A = a * se                                                  # (B, C)
    Cc = c * se                                                 # (B, C)
    ascale_ref[...] = jnp.concatenate([A, A], axis=1).reshape(ascale_ref.shape)
    cscale_ref[...] = jnp.concatenate([Cc, Cc], axis=1).reshape(cscale_ref.shape)


# ---------------------------------------------------------------------------
# Pass 3: apply -- feasc tile = A[b] * (xy @ w1) + Cc[b] (lane-dense 128 wide).
# ---------------------------------------------------------------------------
def _apply_kernel(xy_ref, w1_ref, a_ref, c_ref, out_ref):
    h = jnp.dot(xy_ref[...], w1_ref[...], preferred_element_type=jnp.float32)
    out_ref[...] = a_ref[0] * h + c_ref[0]


# ---------------------------------------------------------------------------
# Parameters / wrapper
# ---------------------------------------------------------------------------
def init_params(key, inchannel=64, reduction=16):
    ks = jax.random.split(key, 6)
    C = inchannel
    return dict(
        w1=jax.random.normal(ks[0], (2 * C, C), jnp.float32) * 0.05,
        # conv bias kept for API parity; it is exactly cancelled by bn1's mean
        # subtraction, so the kernels never read it.
        b1=jax.random.normal(ks[1], (1, C), jnp.float32) * 0.05,
        gamma1=jnp.ones((1, C), jnp.float32),
        beta1=jnp.zeros((1, C), jnp.float32),
        wse1=jax.random.normal(ks[2], (C, C // reduction), jnp.float32) * 0.1,
        wse2=jax.random.normal(ks[3], (C // reduction, C), jnp.float32) * 0.1,
        wc=jax.random.normal(ks[4], (C, 2), jnp.float32) * 0.05,
        bc=jax.random.normal(ks[5], (1, 2), jnp.float32) * 0.05,
        gv=jnp.ones((1, 2), jnp.float32),
        bv=jnp.zeros((1, 2), jnp.float32),
    )


def ahbf_se_forward(x, y, logitx, logity, params):
    """x, y: (B, C, H, W) float32 NCHW; logitx/logity: (B, num_classes)."""
    B, C, H, W = x.shape
    assert C == 64, "SE_Block in the reference module is hard-coded to 64 channels"
    HW = H * W
    assert HW % 2 == 0, "spatial extent must be even for the lane-packed layout"
    R = B * HW
    hw_half = HW // 2
    NC = logitx.shape[1]

    tp, ns = _spatial_tiling(hw_half)
    hw_half_pad = tp * ns
    pad = hw_half_pad - hw_half
    rp_pad = B * hw_half_pad

    # --- layout glue (outside the kernels) ---------------------------------
    # NCHW -> NHWC rows -> packed pixel pairs: (B*HW/2, 4C); lanes [0:2C] is
    # the even pixel, [2C:4C] the odd pixel.  Zero padding rows contribute
    # nothing to the (bias-free) conv sums, so statistics stay exact.
    xy = jnp.concatenate([x, y], axis=1)                                # (B, 2C, H, W)
    xy_rows = jnp.transpose(xy, (0, 2, 3, 1)).reshape(B, hw_half, 4 * C)
    if pad:
        xy_rows = jnp.pad(xy_rows, ((0, 0), (0, pad), (0, 0)))
    xy_packed = xy_rows.reshape(rp_pad, 4 * C).astype(jnp.bfloat16)

    # Block-diagonal packed 1x1-conv weight (two copies of w1), bf16 for MXU.
    w1 = params["w1"]
    z = jnp.zeros_like(w1)
    w1p = jnp.concatenate(
        [jnp.concatenate([w1, z], axis=1), jnp.concatenate([z, w1], axis=1)],
        axis=0).astype(jnp.bfloat16)                                    # (4C, 2C)

    vmem = lambda: pl.BlockSpec(memory_space=pltpu.MemorySpace.VMEM)

    # --- pass 1: reduce (per-batch sums / sumsq of conv output) ------------
    bsum, bssq = pl.pallas_call(
        _reduce_kernel,
        out_shape=(
            jax.ShapeDtypeStruct((B, 1, 2 * C), jnp.float32),
            jax.ShapeDtypeStruct((B, 1, 2 * C), jnp.float32),
        ),
        grid=(B, ns),
        in_specs=[
            pl.BlockSpec((tp, 4 * C), lambda b, s: (b * ns + s, 0)),
            pl.BlockSpec((4 * C, 2 * C), lambda b, s: (0, 0)),
        ],
        out_specs=(
            pl.BlockSpec((1, 1, 2 * C), lambda b, s: (b, 0, 0)),
            pl.BlockSpec((1, 1, 2 * C), lambda b, s: (b, 0, 0)),
        ),
        compiler_params=pltpu.CompilerParams(
            dimension_semantics=("parallel", "arbitrary")),
    )(xy_packed, w1p)

    # --- pass 2: tail (tiny, gridless) --------------------------------------
    ascale, cscale, logit = pl.pallas_call(
        functools.partial(_tail_kernel, n_rows=float(R), hw=float(HW)),
        out_shape=(
            jax.ShapeDtypeStruct((B, 1, 2 * C), jnp.float32),
            jax.ShapeDtypeStruct((B, 1, 2 * C), jnp.float32),
            jax.ShapeDtypeStruct((B, NC), jnp.float32),
        ),
        in_specs=[vmem() for _ in range(12)],
        out_specs=(vmem(), vmem(), vmem()),
    )(bsum, bssq,
      params["gamma1"], params["beta1"], params["wse1"], params["wse2"],
      params["wc"], params["bc"], params["gv"], params["bv"],
      logitx, logity)

    # --- pass 3: apply (feasc tiles) ----------------------------------------
    feasc_packed = pl.pallas_call(
        _apply_kernel,
        out_shape=jax.ShapeDtypeStruct((rp_pad, 2 * C), jnp.float32),
        grid=(B, ns),
        in_specs=[
            pl.BlockSpec((tp, 4 * C), lambda b, s: (b * ns + s, 0)),
            pl.BlockSpec((4 * C, 2 * C), lambda b, s: (0, 0)),
            pl.BlockSpec((1, 1, 2 * C), lambda b, s: (b, 0, 0)),
            pl.BlockSpec((1, 1, 2 * C), lambda b, s: (b, 0, 0)),
        ],
        out_specs=pl.BlockSpec((tp, 2 * C), lambda b, s: (b * ns + s, 0)),
        compiler_params=pltpu.CompilerParams(
            dimension_semantics=("parallel", "parallel")),
    )(xy_packed, w1p, ascale, cscale)

    # --- layout glue: packed rows -> NCHW ------------------------------------
    feasc_pk = feasc_packed.reshape(B, hw_half_pad, 2 * C)
    if pad:
        feasc_pk = feasc_pk[:, :hw_half, :]
    feasc = jnp.transpose(feasc_pk.reshape(B, H, W, C), (0, 3, 1, 2))
    return feasc, logit


if __name__ == "__main__":
    B, C, H, W, NUM_CLASSES = 2, 64, 8, 8, 10

    key = jax.random.PRNGKey(0)
    kx, ky, klx, kly, kp = jax.random.split(key, 5)
    x = jax.random.normal(kx, (B, C, H, W), jnp.float32)
    y = jax.random.normal(ky, (B, C, H, W), jnp.float32)
    logitx = jax.random.normal(klx, (B, NUM_CLASSES), jnp.float32)
    logity = jax.random.normal(kly, (B, NUM_CLASSES), jnp.float32)

    params = init_params(kp, inchannel=C)

    feasc, logit = jax.jit(ahbf_se_forward)(x, y, logitx, logity, params)
    jax.block_until_ready((feasc, logit))

    assert feasc.shape == (B, C, H, W)
    assert logit.shape == (B, NUM_CLASSES)
    print("KERNEL_OK")
</pallas_src>

<mosaic_0001>
module attributes {stable_mosaic.version = 11 : i64} {
  func.func @_reduce_kernel(%arg0: i32, %arg1: i32, %arg2: memref<32x256xbf16, #tpu.memory_space<vmem>>, %arg3: memref<256x128xbf16, #tpu.memory_space<vmem>>, %arg4: memref<1x1x128xf32, #tpu.memory_space<vmem>>, %arg5: memref<1x1x128xf32, #tpu.memory_space<vmem>>) attributes {dimension_semantics = [#tpu.dimension_semantics<parallel>, #tpu.dimension_semantics<arbitrary>], iteration_bounds = array<i64: 2, 1>, scalar_prefetch = 0 : i64, scratch_operands = 0 : i64, tpu.core_type = #tpu.core_type<tc>, window_params = [{transform_indices = @transform_0, window_bounds = array<i64: 32, 256>}, {pipeline_mode = #tpu.pipeline_mode<synchronous>, transform_indices = @transform_1, window_bounds = array<i64: 256, 128>}, {transform_indices = @transform_2, window_bounds = array<i64: 1, 1, 128>}, {transform_indices = @transform_3, window_bounds = array<i64: 1, 1, 128>}]} {
    %c0_i32 = arith.constant 0 : i32
    %0 = arith.cmpi eq, %arg1, %c0_i32 : i32
    %1 = arith.extui %0 : i1 to i32
    %c0_i32_0 = arith.constant 0 : i32
    %2 = arith.cmpi ne, %1, %c0_i32_0 : i32
    scf.if %2 {
      %cst_18 = arith.constant 0.000000e+00 : f32
      %17 = vector.broadcast %cst_18 : f32 to vector<1x1x128xf32>
      %c0_19 = arith.constant 0 : index
      %c0_20 = arith.constant 0 : index
      %c0_21 = arith.constant 0 : index
      %18 = vector.load %arg4[%c0_19, %c0_20, %c0_21] : memref<1x1x128xf32, #tpu.memory_space<vmem>>, vector<1x1x128xf32>
      tpu.vector_store %arg4[%c0_19, %c0_20, %c0_21], %17 {strides = array<i32>} : memref<1x1x128xf32, #tpu.memory_space<vmem>>, vector<1x1x128xf32>,
      %cst_22 = arith.constant 0.000000e+00 : f32
      %19 = vector.broadcast %cst_22 : f32 to vector<1x1x128xf32>
      %c0_23 = arith.constant 0 : index
      %c0_24 = arith.constant 0 : index
      %c0_25 = arith.constant 0 : index
      %20 = vector.load %arg5[%c0_23, %c0_24, %c0_25] : memref<1x1x128xf32, #tpu.memory_space<vmem>>, vector<1x1x128xf32>
      tpu.vector_store %arg5[%c0_23, %c0_24, %c0_25], %19 {strides = array<i32>} : memref<1x1x128xf32, #tpu.memory_space<vmem>>, vector<1x1x128xf32>,
    } else {
    }
    %c0 = arith.constant 0 : index
    %c0_1 = arith.constant 0 : index
    %3 = vector.load %arg2[%c0, %c0_1] : memref<32x256xbf16, #tpu.memory_space<vmem>>, vector<32x256xbf16>
    %c0_2 = arith.constant 0 : index
    %c0_3 = arith.constant 0 : index
    %4 = vector.load %arg3[%c0_2, %c0_3] : memref<256x128xbf16, #tpu.memory_space<vmem>>, vector<256x128xbf16>
    %cst = arith.constant dense<0.000000e+00> : vector<32x128xf32>
    %5 = tpu.matmul %3, %4, %cst {dimension_numbers = #tpu.dot_dimension_numbers<[1], [0], [0], [1], [0, 0, 1, 1], [], []>} : vector<32x256xbf16>, vector<256x128xbf16>, vector<32x128xf32> -> vector<32x128xf32>
    %c0_4 = arith.constant 0 : index
    %c0_5 = arith.constant 0 : index
    %c0_6 = arith.constant 0 : index
    %6 = vector.load %arg4[%c0_4, %c0_5, %c0_6] : memref<1x1x128xf32, #tpu.memory_space<vmem>>, vector<1x1x128xf32>
    %cst_7 = arith.constant dense<0.000000e+00> : vector<128xf32>
    %7 = vector.multi_reduction <add>, %5, %cst_7 [0] : vector<32x128xf32> to vector<128xf32>
    %8 = vector.shape_cast %7 : vector<128xf32> to vector<1x1x128xf32>
    %9 = arith.addf %6, %8 : vector<1x1x128xf32>
    %c0_8 = arith.constant 0 : index
    %c0_9 = arith.constant 0 : index
    %c0_10 = arith.constant 0 : index
    %10 = vector.load %arg4[%c0_8, %c0_9, %c0_10] : memref<1x1x128xf32, #tpu.memory_space<vmem>>, vector<1x1x128xf32>
    tpu.vector_store %arg4[%c0_8, %c0_9, %c0_10], %9 {strides = array<i32>} : memref<1x1x128xf32, #tpu.memory_space<vmem>>, vector<1x1x128xf32>,
    %c0_11 = arith.constant 0 : index
    %c0_12 = arith.constant 0 : index
    %c0_13 = arith.constant 0 : index
    %11 = vector.load %arg5[%c0_11, %c0_12, %c0_13] : memref<1x1x128xf32, #tpu.memory_space<vmem>>, vector<1x1x128xf32>
    %12 = arith.mulf %5, %5 : vector<32x128xf32>
    %cst_14 = arith.constant dense<0.000000e+00> : vector<128xf32>
    %13 = vector.multi_reduction <add>, %12, %cst_14 [0] : vector<32x128xf32> to vector<128xf32>
    %14 = vector.shape_cast %13 : vector<128xf32> to vector<1x1x128xf32>
    %15 = arith.addf %11, %14 : vector<1x1x128xf32>
    %c0_15 = arith.constant 0 : index
    %c0_16 = arith.constant 0 : index
    %c0_17 = arith.constant 0 : index
    %16 = vector.load %arg5[%c0_15, %c0_16, %c0_17] : memref<1x1x128xf32, #tpu.memory_space<vmem>>, vector<1x1x128xf32>
    tpu.vector_store %arg5[%c0_15, %c0_16, %c0_17], %15 {strides = array<i32>} : memref<1x1x128xf32, #tpu.memory_space<vmem>>, vector<1x1x128xf32>,
    return
  }
  func.func @transform_0(%arg0: i32, %arg1: i32) -> (i32, i32) {
    %c1_i32 = arith.constant 1 : i32
    %0 = arith.muli %arg0, %c1_i32 : i32
    %1 = arith.addi %0, %arg1 : i32
    %c0_i32 = arith.constant 0 : i32
    %c0_i32_0 = arith.constant 0 : i32
    return %1, %c0_i32 : i32, i32
  }
  func.func @transform_1(%arg0: i32, %arg1: i32) -> (i32, i32) {
    %c0_i32 = arith.constant 0 : i32
    %c0_i32_0 = arith.constant 0 : i32
    %c0_i32_1 = arith.constant 0 : i32
    return %c0_i32, %c0_i32_0 : i32, i32
  }
  func.func @transform_2(%arg0: i32, %arg1: i32) -> (i32, i32, i32) {
    %c0_i32 = arith.constant 0 : i32
    %c0_i32_0 = arith.constant 0 : i32
    %c0_i32_1 = arith.constant 0 : i32
    return %arg0, %c0_i32, %c0_i32_0 : i32, i32, i32
  }
  func.func @transform_3(%arg0: i32, %arg1: i32) -> (i32, i32, i32) {
    %c0_i32 = arith.constant 0 : i32
    %c0_i32_0 = arith.constant 0 : i32
    %c0_i32_1 = arith.constant 0 : i32
    return %arg0, %c0_i32, %c0_i32_0 : i32, i32, i32
  }
}

module attributes {stable_mosaic.version = 11 : i64} {
  func.func @_apply_kernel(%arg0: i32, %arg1: i32, %arg2: memref<32x256xbf16, #tpu.memory_space<vmem>>, %arg3: memref<256x128xbf16, #tpu.memory_space<vmem>>, %arg4: memref<1x1x128xf32, #tpu.memory_space<vmem>>, %arg5: memref<1x1x128xf32, #tpu.memory_space<vmem>>, %arg6: memref<32x128xf32, #tpu.memory_space<vmem>>) attributes {dimension_semantics = [#tpu.dimension_semantics<parallel>, #tpu.dimension_semantics<parallel>], iteration_bounds = array<i64: 2, 1>, scalar_prefetch = 0 : i64, scratch_operands = 0 : i64, tpu.core_type = #tpu.core_type<tc>, window_params = [{transform_indices = @transform_0, window_bounds = array<i64: 32, 256>}, {pipeline_mode = #tpu.pipeline_mode<synchronous>, transform_indices = @transform_1, window_bounds = array<i64: 256, 128>}, {transform_indices = @transform_2, window_bounds = array<i64: 1, 1, 128>}, {transform_indices = @transform_3, window_bounds = array<i64: 1, 1, 128>}, {transform_indices = @transform_4, window_bounds = array<i64: 32, 128>}]} {
    %c0 = arith.constant 0 : index
    %c0_0 = arith.constant 0 : index
    %0 = vector.load %arg2[%c0, %c0_0] : memref<32x256xbf16, #tpu.memory_space<vmem>>, vector<32x256xbf16>
    %c0_1 = arith.constant 0 : index
    %c0_2 = arith.constant 0 : index
    %1 = vector.load %arg3[%c0_1, %c0_2] : memref<256x128xbf16, #tpu.memory_space<vmem>>, vector<256x128xbf16>
    %cst = arith.constant dense<0.000000e+00> : vector<32x128xf32>
    %2 = tpu.matmul %0, %1, %cst {dimension_numbers = #tpu.dot_dimension_numbers<[1], [0], [0], [1], [0, 0, 1, 1], [], []>} : vector<32x256xbf16>, vector<256x128xbf16>, vector<32x128xf32> -> vector<32x128xf32>
    %c0_3 = arith.constant 0 : index
    %c0_4 = arith.constant 0 : index
    %c0_5 = arith.constant 0 : index
    %3 = vector.load %arg4[%c0_3, %c0_4, %c0_5] : memref<1x1x128xf32, #tpu.memory_space<vmem>>, vector<1x1x128xf32>
    %4 = vector.shape_cast %3 : vector<1x1x128xf32> to vector<1x128xf32>
    %5 = vector.broadcast %4 : vector<1x128xf32> to vector<32x128xf32>
    %6 = arith.mulf %5, %2 : vector<32x128xf32>
    %c0_6 = arith.constant 0 : index
    %c0_7 = arith.constant 0 : index
    %c0_8 = arith.constant 0 : index
    %7 = vector.load %arg5[%c0_6, %c0_7, %c0_8] : memref<1x1x128xf32, #tpu.memory_space<vmem>>, vector<1x1x128xf32>
    %8 = vector.shape_cast %7 : vector<1x1x128xf32> to vector<1x128xf32>
    %9 = vector.broadcast %8 : vector<1x128xf32> to vector<32x128xf32>
    %10 = arith.addf %6, %9 : vector<32x128xf32>
    %c0_9 = arith.constant 0 : index
    %c0_10 = arith.constant 0 : index
    %11 = vector.load %arg6[%c0_9, %c0_10] : memref<32x128xf32, #tpu.memory_space<vmem>>, vector<32x128xf32>
    tpu.vector_store %arg6[%c0_9, %c0_10], %10 {strides = array<i32>} : memref<32x128xf32, #tpu.memory_space<vmem>>, vector<32x128xf32>,
    return
  }
  func.func @transform_0(%arg0: i32, %arg1: i32) -> (i32, i32) {
    %c1_i32 = arith.constant 1 : i32
    %0 = arith.muli %arg0, %c1_i32 : i32
    %1 = arith.addi %0, %arg1 : i32
    %c0_i32 = arith.constant 0 : i32
    %c0_i32_0 = arith.constant 0 : i32
    return %1, %c0_i32 : i32, i32
  }
  func.func @transform_1(%arg0: i32, %arg1: i32) -> (i32, i32) {
    %c0_i32 = arith.constant 0 : i32
    %c0_i32_0 = arith.constant 0 : i32
    %c0_i32_1 = arith.constant 0 : i32
    return %c0_i32, %c0_i32_0 : i32, i32
  }
  func.func @transform_2(%arg0: i32, %arg1: i32) -> (i32, i32, i32) {
    %c0_i32 = arith.constant 0 : i32
    %c0_i32_0 = arith.constant 0 : i32
    %c0_i32_1 = arith.constant 0 : i32
    return %arg0, %c0_i32, %c0_i32_0 : i32, i32, i32
  }
  func.func @transform_3(%arg0: i32, %arg1: i32) -> (i32, i32, i32) {
    %c0_i32 = arith.constant 0 : i32
    %c0_i32_0 = arith.constant 0 : i32
    %c0_i32_1 = arith.constant 0 : i32
    return %arg0, %c0_i32, %c0_i32_0 : i32, i32, i32
  }
  func.func @transform_4(%arg0: i32, %arg1: i32) -> (i32, i32) {
    %c1_i32 = arith.constant 1 : i32
    %0 = arith.muli %arg0, %c1_i32 : i32
    %1 = arith.addi %0, %arg1 : i32
    %c0_i32 = arith.constant 0 : i32
    %c0_i32_0 = arith.constant 0 : i32
    return %1, %c0_i32 : i32, i32
  }
}

module attributes {stable_mosaic.version = 11 : i64} {
  func.func @_tail_kernel(%arg0: memref<2x1x128xf32, #tpu.memory_space<vmem>>, %arg1: memref<2x1x128xf32, #tpu.memory_space<vmem>>, %arg2: memref<1x64xf32, #tpu.memory_space<vmem>>, %arg3: memref<1x64xf32, #tpu.memory_space<vmem>>, %arg4: memref<64x4xf32, #tpu.memory_space<vmem>>, %arg5: memref<4x64xf32, #tpu.memory_space<vmem>>, %arg6: memref<64x2xf32, #tpu.memory_space<vmem>>, %arg7: memref<1x2xf32, #tpu.memory_space<vmem>>, %arg8: memref<1x2xf32, #tpu.memory_space<vmem>>, %arg9: memref<1x2xf32, #tpu.memory_space<vmem>>, %arg10: memref<2x10xf32, #tpu.memory_space<vmem>>, %arg11: memref<2x10xf32, #tpu.memory_space<vmem>>, %arg12: memref<2x1x128xf32, #tpu.memory_space<vmem>>, %arg13: memref<2x1x128xf32, #tpu.memory_space<vmem>>, %arg14: memref<2x10xf32, #tpu.memory_space<vmem>>) attributes {dimension_semantics = [], scalar_prefetch = 0 : i64, scratch_operands = 0 : i64, tpu.core_type = #tpu.core_type<tc>} {
    %c0 = arith.constant 0 : index
    %c0_0 = arith.constant 0 : index
    %c0_1 = arith.constant 0 : index
    %0 = vector.load %arg0[%c0, %c0_0, %c0_1] : memref<2x1x128xf32, #tpu.memory_space<vmem>>, vector<2x1x64xf32>
    %1 = vector.shape_cast %0 : vector<2x1x64xf32> to vector<2x64xf32>
    %c0_2 = arith.constant 0 : index
    %c0_3 = arith.constant 0 : index
    %c64 = arith.constant 64 : index
    %2 = vector.load %arg0[%c0_2, %c0_3, %c64] : memref<2x1x128xf32, #tpu.memory_space<vmem>>, vector<2x1x64xf32>
    %3 = vector.shape_cast %2 : vector<2x1x64xf32> to vector<2x64xf32>
    %4 = arith.addf %1, %3 : vector<2x64xf32>
    %c0_4 = arith.constant 0 : index
    %c0_5 = arith.constant 0 : index
    %c0_6 = arith.constant 0 : index
    %5 = vector.load %arg1[%c0_4, %c0_5, %c0_6] : memref<2x1x128xf32, #tpu.memory_space<vmem>>, vector<2x1x64xf32>
    %6 = vector.shape_cast %5 : vector<2x1x64xf32> to vector<2x64xf32>
    %c0_7 = arith.constant 0 : index
    %c0_8 = arith.constant 0 : index
    %c64_9 = arith.constant 64 : index
    %7 = vector.load %arg1[%c0_7, %c0_8, %c64_9] : memref<2x1x128xf32, #tpu.memory_space<vmem>>, vector<2x1x64xf32>
    %8 = vector.shape_cast %7 : vector<2x1x64xf32> to vector<2x64xf32>
    %9 = arith.addf %6, %8 : vector<2x64xf32>
    %cst = arith.constant dense<0.000000e+00> : vector<64xf32>
    %10 = vector.multi_reduction <add>, %4, %cst [0] : vector<2x64xf32> to vector<64xf32>
    %11 = vector.shape_cast %10 : vector<64xf32> to vector<1x64xf32>
    %cst_10 = arith.constant 7.812500e-03 : f32
    %12 = vector.broadcast %cst_10 : f32 to vector<1x64xf32>
    %13 = arith.mulf %11, %12 : vector<1x64xf32>
    %cst_11 = arith.constant dense<0.000000e+00> : vector<64xf32>
    %14 = vector.multi_reduction <add>, %9, %cst_11 [0] : vector<2x64xf32> to vector<64xf32>
    %15 = vector.shape_cast %14 : vector<64xf32> to vector<1x64xf32>
    %cst_12 = arith.constant 7.812500e-03 : f32
    %16 = vector.broadcast %cst_12 : f32 to vector<1x64xf32>
    %17 = arith.mulf %15, %16 : vector<1x64xf32>
    %18 = arith.mulf %13, %13 : vector<1x64xf32>
    %19 = arith.subf %17, %18 : vector<1x64xf32>
    %c0_13 = arith.constant 0 : index
    %c0_14 = arith.constant 0 : index
    %20 = vector.load %arg2[%c0_13, %c0_14] : memref<1x64xf32, #tpu.memory_space<vmem>>, vector<1x64xf32>
    %cst_15 = arith.constant 9.99999974E-6 : f32
    %21 = vector.broadcast %cst_15 : f32 to vector<1x64xf32>
    %22 = arith.addf %19, %21 : vector<1x64xf32>
    %23 = math.rsqrt %22 : vector<1x64xf32>
    %24 = arith.mulf %20, %23 : vector<1x64xf32>
    %c0_16 = arith.constant 0 : index
    %c0_17 = arith.constant 0 : index
    %25 = vector.load %arg3[%c0_16, %c0_17] : memref<1x64xf32, #tpu.memory_space<vmem>>, vector<1x64xf32>
    %26 = arith.mulf %24, %13 : vector<1x64xf32>
    %27 = arith.subf %25, %26 : vector<1x64xf32>
    %cst_18 = arith.constant 1.562500e-02 : f32
    %28 = vector.broadcast %cst_18 : f32 to vector<2x64xf32>
    %29 = arith.mulf %4, %28 : vector<2x64xf32>
    %30 = vector.broadcast %24 : vector<1x64xf32> to vector<2x64xf32>
    %31 = arith.mulf %30, %29 : vector<2x64xf32>
    %32 = vector.broadcast %27 : vector<1x64xf32> to vector<2x64xf32>
    %33 = arith.addf %31, %32 : vector<2x64xf32>
    %c0_19 = arith.constant 0 : index
    %c0_20 = arith.constant 0 : index
    %34 = vector.load %arg4[%c0_19, %c0_20] : memref<64x4xf32, #tpu.memory_space<vmem>>, vector<64x4xf32>
    %cst_21 = arith.constant dense<0.000000e+00> : vector<2x4xf32>
    %35 = tpu.matmul %33, %34, %cst_21 {dimension_numbers = #tpu.dot_dimension_numbers<[1], [0], [0], [1], [0, 0, 1, 1], [], []>} : vector<2x64xf32>, vector<64x4xf32>, vector<2x4xf32> -> vector<2x4xf32>
    %cst_22 = arith.constant 0.000000e+00 : f32
    %36 = vector.broadcast %cst_22 : f32 to vector<2x4xf32>
    %37 = arith.maximumf %35, %36 : vector<2x4xf32>
    %c0_23 = arith.constant 0 : index
    %c0_24 = arith.constant 0 : index
    %38 = vector.load %arg5[%c0_23, %c0_24] : memref<4x64xf32, #tpu.memory_space<vmem>>, vector<4x64xf32>
    %cst_25 = arith.constant dense<0.000000e+00> : vector<2x64xf32>
    %39 = tpu.matmul %37, %38, %cst_25 {dimension_numbers = #tpu.dot_dimension_numbers<[1], [0], [0], [1], [0, 0, 1, 1], [], []>} : vector<2x4xf32>, vector<4x64xf32>, vector<2x64xf32> -> vector<2x64xf32>
    %cst_26 = arith.constant 0.000000e+00 : f32
    %40 = vector.broadcast %cst_26 : f32 to vector<2x64xf32>
    %41 = arith.subf %40, %39 : vector<2x64xf32>
    %42 = math.exp %41 : vector<2x64xf32>
    %cst_27 = arith.constant 1.000000e+00 : f32
    %43 = vector.broadcast %cst_27 : f32 to vector<2x64xf32>
    %44 = arith.addf %43, %42 : vector<2x64xf32>
    %cst_28 = arith.constant 1.000000e+00 : f32
    %45 = vector.broadcast %cst_28 : f32 to vector<2x64xf32>
    %46 = arith.divf %45, %44 : vector<2x64xf32>
    %47 = arith.mulf %46, %33 : vector<2x64xf32>
    %c0_29 = arith.constant 0 : index
    %c0_30 = arith.constant 0 : index
    %48 = vector.load %arg6[%c0_29, %c0_30] : memref<64x2xf32, #tpu.memory_space<vmem>>, vector<64x2xf32>
    %cst_31 = arith.constant dense<0.000000e+00> : vector<2x2xf32>
    %49 = tpu.matmul %47, %48, %cst_31 {dimension_numbers = #tpu.dot_dimension_numbers<[1], [0], [0], [1], [0, 0, 1, 1], [], []>} : vector<2x64xf32>, vector<64x2xf32>, vector<2x2xf32> -> vector<2x2xf32>
    %c0_32 = arith.constant 0 : index
    %c0_33 = arith.constant 0 : index
    %50 = vector.load %arg7[%c0_32, %c0_33] : memref<1x2xf32, #tpu.memory_space<vmem>>, vector<1x2xf32>
    %51 = vector.broadcast %50 : vector<1x2xf32> to vector<2x2xf32>
    %52 = arith.addf %49, %51 : vector<2x2xf32>
    %cst_34 = arith.constant dense<0.000000e+00> : vector<2xf32>
    %53 = vector.multi_reduction <add>, %52, %cst_34 [0] : vector<2x2xf32> to vector<2xf32>
    %54 = vector.shape_cast %53 : vector<2xf32> to vector<1x2xf32>
    %cst_35 = arith.constant 2.000000e+00 : f32
    %55 = vector.broadcast %cst_35 : f32 to vector<1x2xf32>
    %56 = arith.divf %54, %55 : vector<1x2xf32>
    %57 = vector.broadcast %56 : vector<1x2xf32> to vector<2x2xf32>
    %58 = arith.subf %52, %57 : vector<2x2xf32>
    %59 = arith.mulf %58, %58 : vector<2x2xf32>
    %cst_36 = arith.constant dense<0.000000e+00> : vector<2xf32>
    %60 = vector.multi_reduction <add>, %59, %cst_36 [0] : vector<2x2xf32> to vector<2xf32>
    %61 = vector.shape_cast %60 : vector<2xf32> to vector<1x2xf32>
    %cst_37 = arith.constant 2.000000e+00 : f32
    %62 = vector.broadcast %cst_37 : f32 to vector<1x2xf32>
    %63 = arith.divf %61, %62 : vector<1x2xf32>
    %c0_38 = arith.constant 0 : index
    %c0_39 = arith.constant 0 : index
    %64 = vector.load %arg8[%c0_38, %c0_39] : memref<1x2xf32, #tpu.memory_space<vmem>>, vector<1x2xf32>
    %65 = vector.broadcast %56 : vector<1x2xf32> to vector<2x2xf32>
    %66 = arith.subf %52, %65 : vector<2x2xf32>
    %67 = vector.broadcast %64 : vector<1x2xf32> to vector<2x2xf32>
    %68 = arith.mulf %67, %66 : vector<2x2xf32>
    %cst_40 = arith.constant 9.99999974E-6 : f32
    %69 = vector.broadcast %cst_40 : f32 to vector<1x2xf32>
    %70 = arith.addf %63, %69 : vector<1x2xf32>
    %71 = math.rsqrt %70 : vector<1x2xf32>
    %72 = vector.broadcast %71 : vector<1x2xf32> to vector<2x2xf32>
    %73 = arith.mulf %68, %72 : vector<2x2xf32>
    %c0_41 = arith.constant 0 : index
    %c0_42 = arith.constant 0 : index
    %74 = vector.load %arg9[%c0_41, %c0_42] : memref<1x2xf32, #tpu.memory_space<vmem>>, vector<1x2xf32>
    %75 = vector.broadcast %74 : vector<1x2xf32> to vector<2x2xf32>
    %76 = arith.addf %73, %75 : vector<2x2xf32>
    %cst_43 = arith.constant 0.000000e+00 : f32
    %77 = vector.broadcast %cst_43 : f32 to vector<2x2xf32>
    %78 = arith.maximumf %76, %77 : vector<2x2xf32>
    %cst_44 = arith.constant dense<0xFF800000> : vector<2xf32>
    %79 = vector.multi_reduction <maximumf>, %78, %cst_44 [1] : vector<2x2xf32> to vector<2xf32>
    %80 = vector.shape_cast %79 : vector<2xf32> to vector<2x1xf32>
    %81 = vector.broadcast %80 : vector<2x1xf32> to vector<2x2xf32>
    %82 = arith.subf %78, %81 : vector<2x2xf32>
    %83 = math.exp %82 : vector<2x2xf32>
    %cst_45 = arith.constant dense<0.000000e+00> : vector<2xf32>
    %84 = vector.multi_reduction <add>, %83, %cst_45 [1] : vector<2x2xf32> to vector<2xf32>
    %85 = vector.shape_cast %84 : vector<2xf32> to vector<2x1xf32>
    %86 = vector.broadcast %85 : vector<2x1xf32> to vector<2x2xf32>
    %87 = arith.divf %83, %86 : vector<2x2xf32>
    %88 = vector.extract_strided_slice %87 {offsets = [0, 0], sizes = [2, 1], strides = [1, 1]} : vector<2x2xf32> to vector<2x1xf32>
    %c0_46 = arith.constant 0 : index
    %c0_47 = arith.constant 0 : index
    %89 = vector.load %arg10[%c0_46, %c0_47] : memref<2x10xf32, #tpu.memory_space<vmem>>, vector<2x10xf32>
    %90 = vector.broadcast %88 : vector<2x1xf32> to vector<2x10xf32>
    %91 = arith.mulf %90, %89 : vector<2x10xf32>
    %92 = vector.extract_strided_slice %87 {offsets = [0, 1], sizes = [2, 1], strides = [1, 1]} : vector<2x2xf32> to vector<2x1xf32>
    %c0_48 = arith.constant 0 : index
    %c0_49 = arith.constant 0 : index
    %93 = vector.load %arg11[%c0_48, %c0_49] : memref<2x10xf32, #tpu.memory_space<vmem>>, vector<2x10xf32>
    %94 = vector.broadcast %92 : vector<2x1xf32> to vector<2x10xf32>
    %95 = arith.mulf %94, %93 : vector<2x10xf32>
    %96 = arith.addf %91, %95 : vector<2x10xf32>
    %c0_50 = arith.constant 0 : index
    %c0_51 = arith.constant 0 : index
    %97 = vector.load %arg14[%c0_50, %c0_51] : memref<2x10xf32, #tpu.memory_space<vmem>>, vector<2x10xf32>
    tpu.vector_store %arg14[%c0_50, %c0_51], %96 {strides = array<i32>} : memref<2x10xf32, #tpu.memory_space<vmem>>, vector<2x10xf32>,
    %98 = vector.broadcast %24 : vector<1x64xf32> to vector<2x64xf32>
    %99 = arith.mulf %98, %46 : vector<2x64xf32>
    %100 = vector.broadcast %27 : vector<1x64xf32> to vector<2x64xf32>
    %101 = arith.mulf %100, %46 : vector<2x64xf32>
    %102 = tpu.concatenate %99, %99 in 1 : vector<2x64xf32>, vector<2x64xf32> -> vector<2x128xf32>
    %103 = vector.shape_cast %102 : vector<2x128xf32> to vector<2x1x128xf32>
    %c0_52 = arith.constant 0 : index
    %c0_53 = arith.constant 0 : index
    %c0_54 = arith.constant 0 : index
    %104 = vector.load %arg12[%c0_52, %c0_53, %c0_54] : memref<2x1x128xf32, #tpu.memory_space<vmem>>, vector<2x1x128xf32>
    tpu.vector_store %arg12[%c0_52, %c0_53, %c0_54], %103 {strides = array<i32>} : memref<2x1x128xf32, #tpu.memory_space<vmem>>, vector<2x1x128xf32>,
    %105 = tpu.concatenate %101, %101 in 1 : vector<2x64xf32>, vector<2x64xf32> -> vector<2x128xf32>
    %106 = vector.shape_cast %105 : vector<2x128xf32> to vector<2x1x128xf32>
    %c0_55 = arith.constant 0 : index
    %c0_56 = arith.constant 0 : index
    %c0_57 = arith.constant 0 : index
    %107 = vector.load %arg13[%c0_55, %c0_56, %c0_57] : memref<2x1x128xf32, #tpu.memory_space<vmem>>, vector<2x1x128xf32>
    tpu.vector_store %arg13[%c0_55, %c0_56, %c0_57], %106 {strides = array<i32>} : memref<2x1x128xf32, #tpu.memory_space<vmem>>, vector<2x1x128xf32>,
    return
  }
}

</mosaic_0001>

<bundles_post_ra>
// kernel: ahbf_se_forward.3
= control target key start
LH: loop header
LB: loop body
LE: loop exit
PB: predicated region body
PF: predicated region fallthrough
CT: control target
= control target key end

     0   :  { %s683_s12 = smov 0   ;;  %s685_s13 = smov 0   ;;  %s782_s0 = inlined_call_operand.vmem [shape: bf16[64,256], index: 0, kind: input, shape index: {}]   ;;  %s783_s1 = inlined_call_operand.vmem [shape: bf16[256,128], index: 1, kind: input, shape index: {}]   ;;  %s784_s2 = inlined_call_operand.vmem [shape: f32[2,1,128], index: 2, kind: output, shape index: {0}]   ;;  %s785_s3 = inlined_call_operand.vmem [shape: f32[2,1,128], index: 3, kind: output, shape index: {1}]  }
   0x1   :  { %s687_s14 = smov 0  }
   0x2 LB: > { %s26_s15 = sadd.s32 1, %s656_s13  ;;  %p520_p0 = scmp.ge.s32.totalorder %s660_s14, 1  ;;  %s660_s14 = sphi %s687_s14, %s14_s14   ;;  %s656_s13 = sphi %s685_s13, %s787_s13   ;;  %s652_s12 = sphi %s683_s12, %s786_s12  }
   0x3   : > { %p28_p1 = scmp.ge.s32.totalorder %s26_s15, 2  ;;  %p158_p2 = scmp.lt.s32.totalorder %s660_s14, 3 }
   0x5   : > { %s789_s15 = smov (%p28_p1, %s26_s15), 0  ;;  %p159_p3 = pnand %p520_p0, %p158_p2 }
   0x6   : > { %s521_s18 = sshll.u32 (!%p159_p3), %s652_s12, 2  ;;  %p194_p5 = scmp.lt.s32.totalorder (!%p159_p3), %s652_s12, 1 }
   0x7   : > { %162 = sbr.rel (%p159_p3) target bundleno = 269 (0x10d), region = 28  ;;  %p187_p4 = scmp.lt.s32.totalorder (!%p159_p3), %s521_s18, 7 }
   0xc   : > { %v616_v0 = vld [vmem:[%s783_s1 + $0x78] sm:$0xff]   ;;  %v618_v2 = vld [vmem:[%s783_s1 + $0x70] sm:$0xff]   ;;  %v620_v4 = vld [vmem:[%s783_s1 + $0x68] sm:$0xff]   ;;  %s791_s18 = smov (!%p187_p4, %s521_s18), 7  ;;  %s793_s12 = smov (!%p194_p5, %s652_s12), 1  ;;  %v662_v20 = vmov 0.0  }
   0xd   : > { %v617_v1 = vld [vmem:[%s783_s1 + $0x38] sm:$0xff]   ;;  %547 = vmatprep.subr.bf16.mxu0 %v616_v0  ;;  %575 = vmatprep.subr.bf16.mxu1 %v616_v0  ;;  %v619_v3 = vld [vmem:[%s783_s1 + $0x30] sm:$0xff]   ;;  %v621_v5 = vld [vmem:[%s783_s1 + $0x28] sm:$0xff]   ;;  %s546_s6 = sshll.u32 %s791_s18, 3  ;;  %s760_s5 = scalar_lea.vmem %s784_s2, %s793_s12 }
   0xe   : > { %548 = vmatpush3.bf16.msra.mxu0 %v617_v1  ;;  %583 = vmatpush3.bf16.msra.mxu1 %v617_v1  ;;  %v622_v6 = vld [vmem:[%s783_s1 + $0x60] sm:$0xff]   ;;  %v624_v8 = vld [vmem:[%s783_s1 + $0x58] sm:$0xff]   ;;  %s191_s11 = scalar_lea.vmem %s782_s0, %s546_s6  ;;  %v626_v10 = vld [vmem:[%s783_s1 + $0x50] sm:$0xff]   ;;  %s765_s8 = scalar_lea.vmem %s785_s3, %s793_s12  ;;  %205 = vst [vmem:[%s760_s5] sm:$0x1] %v662_v20 }
   0xf   : > { %549 = vmatprep.subr.bf16.mxu0 %v618_v2  ;;  %576 = vmatprep.subr.bf16.mxu1 %v618_v2  ;;  %v623_v7 = vld [vmem:[%s783_s1 + $0x20] sm:$0xff]   ;;  %v625_v9 = vld [vmem:[%s783_s1 + $0x18] sm:$0xff]   ;;  %v627_v13 = vld [vmem:[%s783_s1 + $0x10] sm:$0xff]   ;;  %206 = vst [vmem:[%s765_s8] sm:$0x1] %v662_v20 }
  0x10   : > { %v634_v11 = vld [vmem:[%s191_s11 + $0x4] ss:$8 sps:$4 sm:$0xff]   ;;  %v637_v12 = vld [vmem:[%s191_s11 + $0x14] ss:$8 sps:$4 sm:$0xff]   ;;  %v632_v18 = vld [vmem:[%s191_s11] ss:$8 sps:$4 sm:$0xff]  }
  0x11   : > { %v628_v14 = vld [vmem:[%s783_s1 + $0x48] sm:$0xff]   ;;  %391 = vmatprep.mubr.bf16.mxu0 %v634_v11  ;;  %399 = vmatprep.mubr.bf16.mxu1 %v637_v12  ;;  %v630_v16 = vld [vmem:[%s783_s1 + $0x40] sm:$0xff]   ;;  %v635_v19 = vld [vmem:[%s191_s11 + $0x10] ss:$8 sps:$4 sm:$0xff]  }
  0x12   : > { %550 = vmatpush3.bf16.msra.mxu0 %v619_v3  ;;  %584 = vmatpush3.bf16.msra.mxu1 %v619_v3  ;;  %v629_v15 = vld [vmem:[%s783_s1 + $0x8] sm:$0xff]   ;;  %v631_v17 = vld [vmem:[%s783_s1] sm:$0xff]  }
  0x13   : > { %551 = vmatprep.subr.bf16.mxu0 %v620_v4  ;;  %577 = vmatprep.subr.bf16.mxu1 %v620_v4 }
  0x15   : > { %v408_v52 = vld [vmem:[%s760_s5] sm:$0x1] }
  0x16   : > { %552 = vmatpush3.bf16.msra.mxu0 %v621_v5  ;;  %585 = vmatpush3.bf16.msra.mxu1 %v621_v5  ;;  %v420_v55 = vld [vmem:[%s765_s8] sm:$0x1] }
  0x17   : > { %553 = vmatprep.subr.bf16.mxu0 %v622_v6  ;;  %578 = vmatprep.subr.bf16.mxu1 %v622_v6 }
  0x1a   : > { %554 = vmatpush3.bf16.msra.mxu0 %v623_v7  ;;  %586 = vmatpush3.bf16.msra.mxu1 %v623_v7 }
  0x1b   : > { %555 = vmatprep.subr.bf16.mxu0 %v624_v8  ;;  %579 = vmatprep.subr.bf16.mxu1 %v624_v8 }
  0x1e   : > { %556 = vmatpush3.bf16.msra.mxu0 %v625_v9  ;;  %587 = vmatpush3.bf16.msra.mxu1 %v625_v9 }
  0x1f   : > { %557 = vmatprep.subr.bf16.mxu0 %v626_v10  ;;  %580 = vmatprep.subr.bf16.mxu1 %v626_v10 }
  0x22   : > { %558 = vmatpush3.bf16.msra.mxu0 %v627_v13  ;;  %588 = vmatpush3.bf16.msra.mxu1 %v627_v13 }
  0x23   : > { %559 = vmatprep.subr.bf16.mxu0 %v628_v14  ;;  %581 = vmatprep.subr.bf16.mxu1 %v628_v14 }
  0x26   : > { %560 = vmatpush3.bf16.msra.mxu0 %v629_v15  ;;  %589 = vmatpush3.bf16.msra.mxu1 %v629_v15 }
  0x27   : > { %561 = vmatprep.subr.bf16.mxu0 %v630_v16  ;;  %582 = vmatprep.subr.bf16.mxu1 %v630_v16 }
  0x2a   : > { %562 = vmatpush3.bf16.msra.mxu0 %v631_v17  ;;  %590 = vmatpush3.bf16.msra.mxu1 %v631_v17 }
  0x2d   : > { %392 = vmatmul.mubr.bf16.vlgmr.msra.gmra.mxu0 %v632_v18  ;;  %400 = vmatmul.mubr.bf16.vlgmr.msra.gmra.mxu1 %v635_v19 }
  0xed   : > { %v563_v21 = vpop.f32.mrf.mxu0  ;;  %v569_v22 = vpop.f32.mrf.mxu1 }
  0xef   : > { %v564_v23 = vpop.f32.mrf.mxu0  ;;  %v570_v24 = vpop.f32.mrf.mxu1 }
  0xf0   : > { %v565_v27 = vadd.f32 %v564_v23, %v563_v21  ;;  %v571_v30 = vadd.f32 %v570_v24, %v569_v22 }
  0xf1   : > { %v566_v25 = vpop.f32.mrf.mxu0  ;;  %v572_v26 = vpop.f32.mrf.mxu1 }
  0xf2   : > { %v421_v32 = vmul.f32 %v565_v27, %v565_v27  ;;  %v423_v36 = vmul.f32 %v571_v30, %v571_v30 }
  0xf3   : > { %v567_v28 = vpop.f32.mrf.mxu0  ;;  %v573_v29 = vpop.f32.mrf.mxu1 }
  0xf4   : > { %v568_v31 = vadd.f32 %v567_v28, %v566_v25  ;;  %v574_v35 = vadd.f32 %v573_v29, %v572_v26 }
  0xf6   : > { %v409_v33 = vadd.f32 %v568_v31, %v565_v27  ;;  %v422_v34 = vmul.f32 %v568_v31, %v568_v31  ;;  %v424_v40 = vmul.f32 %v574_v35, %v574_v35 }
  0xf8   : > { %v425_v37 = vadd.f32 %v422_v34, %v421_v32  ;;  %v410_v38 = vadd.f32 %v571_v30, %v409_v33 }
  0xfa   : > { %v411_v39 = vadd.f32 %v574_v35, %v410_v38  ;;  %v426_v41 = vadd.f32 %v425_v37, %v423_v36 }
  0xfc   : > { %v412_v42 = vrot.slane %v411_v39, 4  ;;  %v427_v43 = vadd.f32 %v426_v41, %v424_v40 }
  0xfe   : > { %v413_v44 = vadd.f32 %v412_v42, %v411_v39  ;;  %v428_v45 = vrot.slane %v427_v43, 4 }
 0x100   : > { %v414_v46 = vrot.slane %v413_v44, 2  ;;  %v429_v47 = vadd.f32 %v428_v45, %v427_v43 }
 0x102   : > { %v415_v48 = vadd.f32 %v414_v46, %v413_v44  ;;  %v430_v49 = vrot.slane %v429_v47, 2 }
 0x104   : > { %v416_v50 = vrot.slane %v415_v48, 1  ;;  %v431_v51 = vadd.f32 %v430_v49, %v429_v47 }
 0x106   : > { %v417_v53 = vadd.f32 %v416_v50, %v415_v48  ;;  %v432_v54 = vrot.slane %v431_v51, 1 }
 0x108   : > { %v418_v56 = vadd.f32 %v417_v53, %v408_v52  ;;  %v433_v57 = vadd.f32 %v432_v54, %v431_v51 }
 0x10a   : > { %419 = vst [vmem:[%s760_s5] sm:$0x1] %v418_v56  ;;  %v434_v58 = vadd.f32 %v433_v57, %v420_v55 }
 0x10c   : > { %435 = vst [vmem:[%s765_s8] sm:$0x1] %v434_v58 }
 0x10d PF: > { %s14_s14 = sadd.s32 1, %s660_s14   ;;  %s786_s12 = smov %s656_s13 }
 0x10e   : > { %p11_p6 = scmp.ge.s32.totalorder %s14_s14, 4   ;;  %s787_s13 = smov %s789_s15 }
 0x110   :  { %13 = sbr.rel (!%p11_p6) target bundleno = 2 (0x2), region = 74 }

// kernel: ahbf_se_forward.5
= control target key start
LH: loop header
LB: loop body
LE: loop exit
PB: predicated region body
PF: predicated region fallthrough
CT: control target
= control target key end

     0   :  { %s744_s15 = smov 0   ;;  %s746_s16 = smov 0   ;;  %s843_s0 = inlined_call_operand.vmem [shape: bf16[64,256], index: 0, kind: input, shape index: {}]   ;;  %s844_s1 = inlined_call_operand.vmem [shape: bf16[256,128], index: 1, kind: input, shape index: {}]   ;;  %s845_s2 = inlined_call_operand.vmem [shape: f32[2,1,128], index: 2, kind: input, shape index: {}]   ;;  %s846_s3 = inlined_call_operand.vmem [shape: f32[2,1,128], index: 3, kind: input, shape index: {}]   ;;  %s847_s4 = inlined_call_operand.vmem [shape: f32[64,128], index: 4, kind: output, shape index: {}]  }
   0x1   :  { %s748_s17 = smov 0  }
   0x2 LB: > { %s26_s18 = sadd.s32 1, %s713_s16  ;;  %p574_p0 = scmp.ge.s32.totalorder %s717_s17, 1  ;;  %s717_s17 = sphi %s748_s17, %s14_s17   ;;  %s713_s16 = sphi %s746_s16, %s849_s16   ;;  %s709_s15 = sphi %s744_s15, %s848_s15  }
   0x3   : > { %p28_p1 = scmp.ge.s32.totalorder %s26_s18, 2  ;;  %p198_p2 = scmp.lt.s32.totalorder %s717_s17, 3 }
   0x5   : > { %s851_s18 = smov (%p28_p1, %s26_s18), 0  ;;  %p199_p3 = pnand %p574_p0, %p198_p2 }
   0x6   : > { %s575_s21 = sshll.u32 (!%p199_p3), %s709_s15, 2  ;;  %p242_p5 = scmp.lt.s32.totalorder (!%p199_p3), %s709_s15, 1 }
   0x7   : > { %202 = sbr.rel (%p199_p3) target bundleno = 251 (0xfb), region = 36  ;;  %p235_p4 = scmp.lt.s32.totalorder (!%p199_p3), %s575_s21, 7 }
   0xc   : > { %v673_v0 = vld [vmem:[%s844_s1 + $0x78] sm:$0xff]   ;;  %v675_v2 = vld [vmem:[%s844_s1 + $0x70] sm:$0xff]   ;;  %v677_v4 = vld [vmem:[%s844_s1 + $0x68] sm:$0xff]   ;;  %s853_s21 = smov (!%p235_p4, %s575_s21), 7  ;;  %s855_s15 = smov (!%p242_p5, %s709_s15), 1 }
   0xd   : > { %v674_v1 = vld [vmem:[%s844_s1 + $0x38] sm:$0xff]   ;;  %605 = vmatprep.subr.bf16.mxu0 %v673_v0  ;;  %633 = vmatprep.subr.bf16.mxu1 %v673_v0  ;;  %v676_v3 = vld [vmem:[%s844_s1 + $0x30] sm:$0xff]   ;;  %v678_v5 = vld [vmem:[%s844_s1 + $0x28] sm:$0xff]   ;;  %s604_s10 = sshll.u32 %s853_s21, 3  ;;  %s244_s12 = scalar_lea.vmem %s845_s2, %s855_s15 }
   0xe   : > { %606 = vmatpush3.bf16.msra.mxu0 %v674_v1  ;;  %641 = vmatpush3.bf16.msra.mxu1 %v674_v1  ;;  %v679_v6 = vld [vmem:[%s844_s1 + $0x60] sm:$0xff]   ;;  %v681_v8 = vld [vmem:[%s844_s1 + $0x58] sm:$0xff]   ;;  %s239_s19 = scalar_lea.vmem %s843_s0, %s604_s10  ;;  %v683_v10 = vld [vmem:[%s844_s1 + $0x50] sm:$0xff]   ;;  %s247_s20 = scalar_lea.vmem %s846_s3, %s855_s15 }
   0xf   : > { %607 = vmatprep.subr.bf16.mxu0 %v675_v2  ;;  %634 = vmatprep.subr.bf16.mxu1 %v675_v2  ;;  %v680_v7 = vld [vmem:[%s844_s1 + $0x20] sm:$0xff]   ;;  %v682_v9 = vld [vmem:[%s844_s1 + $0x18] sm:$0xff]   ;;  %v684_v13 = vld [vmem:[%s844_s1 + $0x10] sm:$0xff]   ;;  %s253_s23 = scalar_lea.vmem %s847_s4, %s604_s10 }
  0x10   : > { %v691_v11 = vld [vmem:[%s239_s19 + $0x4] ss:$8 sps:$4 sm:$0xff]   ;;  %v694_v12 = vld [vmem:[%s239_s19 + $0x14] ss:$8 sps:$4 sm:$0xff]   ;;  %v689_v18 = vld [vmem:[%s239_s19] ss:$8 sps:$4 sm:$0xff]  }
  0x11   : > { %v685_v14 = vld [vmem:[%s844_s1 + $0x48] sm:$0xff]   ;;  %441 = vmatprep.mubr.bf16.mxu0 %v691_v11  ;;  %449 = vmatprep.mubr.bf16.mxu1 %v694_v12  ;;  %v687_v16 = vld [vmem:[%s844_s1 + $0x40] sm:$0xff]   ;;  %v692_v19 = vld [vmem:[%s239_s19 + $0x10] ss:$8 sps:$4 sm:$0xff]  }
  0x12   : > { %608 = vmatpush3.bf16.msra.mxu0 %v676_v3  ;;  %642 = vmatpush3.bf16.msra.mxu1 %v676_v3  ;;  %v686_v15 = vld [vmem:[%s844_s1 + $0x8] sm:$0xff]   ;;  %v688_v17 = vld [vmem:[%s844_s1] sm:$0xff]  }
  0x13   : > { %609 = vmatprep.subr.bf16.mxu0 %v677_v4  ;;  %635 = vmatprep.subr.bf16.mxu1 %v677_v4  ;;  %v600_v23 = vld [vmem:[%s244_s12] ss:$0 sm:$0xff] }
  0x14   : > { %v601_v26 = vld [vmem:[%s247_s20] ss:$0 sm:$0xff] }
  0x16   : > { %610 = vmatpush3.bf16.msra.mxu0 %v678_v5  ;;  %643 = vmatpush3.bf16.msra.mxu1 %v678_v5 }
  0x17   : > { %611 = vmatprep.subr.bf16.mxu0 %v679_v6  ;;  %636 = vmatprep.subr.bf16.mxu1 %v679_v6 }
  0x1a   : > { %612 = vmatpush3.bf16.msra.mxu0 %v680_v7  ;;  %644 = vmatpush3.bf16.msra.mxu1 %v680_v7 }
  0x1b   : > { %613 = vmatprep.subr.bf16.mxu0 %v681_v8  ;;  %637 = vmatprep.subr.bf16.mxu1 %v681_v8 }
  0x1e   : > { %614 = vmatpush3.bf16.msra.mxu0 %v682_v9  ;;  %645 = vmatpush3.bf16.msra.mxu1 %v682_v9 }
  0x1f   : > { %615 = vmatprep.subr.bf16.mxu0 %v683_v10  ;;  %638 = vmatprep.subr.bf16.mxu1 %v683_v10 }
  0x22   : > { %616 = vmatpush3.bf16.msra.mxu0 %v684_v13  ;;  %646 = vmatpush3.bf16.msra.mxu1 %v684_v13 }
  0x23   : > { %617 = vmatprep.subr.bf16.mxu0 %v685_v14  ;;  %639 = vmatprep.subr.bf16.mxu1 %v685_v14 }
  0x26   : > { %618 = vmatpush3.bf16.msra.mxu0 %v686_v15  ;;  %647 = vmatpush3.bf16.msra.mxu1 %v686_v15 }
  0x27   : > { %619 = vmatprep.subr.bf16.mxu0 %v687_v16  ;;  %640 = vmatprep.subr.bf16.mxu1 %v687_v16 }
  0x2a   : > { %620 = vmatpush3.bf16.msra.mxu0 %v688_v17  ;;  %648 = vmatpush3.bf16.msra.mxu1 %v688_v17 }
  0x2d   : > { %442 = vmatmul.mubr.bf16.vlgmr.msra.gmra.mxu0 %v689_v18  ;;  %450 = vmatmul.mubr.bf16.vlgmr.msra.gmra.mxu1 %v692_v19 }
  0xed   : > { %v621_v20 = vpop.f32.mrf.mxu0  ;;  %v627_v21 = vpop.f32.mrf.mxu1 }
  0xef   : > { %v622_v22 = vpop.f32.mrf.mxu0  ;;  %v628_v24 = vpop.f32.mrf.mxu1 }
  0xf0   : > { %v623_v25 = vadd.f32 %v622_v22, %v621_v20  ;;  %v629_v27 = vadd.f32 %v628_v24, %v627_v21 }
  0xf1   : > { %v624_v28 = vpop.f32.mrf.mxu0  ;;  %v630_v29 = vpop.f32.mrf.mxu1 }
  0xf2   : > { %v465_v30 = vmul.f32 %v623_v25, %v600_v23  ;;  %v467_v36 = vmul.f32 %v629_v27, %v600_v23 }
  0xf3   : > { %v625_v31 = vpop.f32.mrf.mxu0  ;;  %v631_v32 = vpop.f32.mrf.mxu1 }
  0xf4   : > { %v476_v33 = vadd.f32 %v601_v26, %v465_v30  ;;  %v626_v34 = vadd.f32 %v625_v31, %v624_v28  ;;  %v632_v35 = vadd.f32 %v631_v32, %v630_v29  ;;  %v478_v40 = vadd.f32 %v601_v26, %v467_v36 }
  0xf6   : > { %480 = vst [vmem:[%s253_s23] sm:$0xff] %v476_v33  ;;  %v466_v37 = vmul.f32 %v626_v34, %v600_v23  ;;  %v468_v38 = vmul.f32 %v632_v35, %v600_v23  ;;  %482 = vst [vmem:[%s253_s23 + $0x10] sm:$0xff] %v478_v40 }
  0xf8   : > { %v477_v39 = vadd.f32 %v601_v26, %v466_v37  ;;  %v479_v41 = vadd.f32 %v601_v26, %v468_v38 }
  0xfa   : > { %481 = vst [vmem:[%s253_s23 + $0x8] sm:$0xff] %v477_v39  ;;  %483 = vst [vmem:[%s253_s23 + $0x18] sm:$0xff] %v479_v41 }
  0xfb PF: > { %s14_s17 = sadd.s32 1, %s717_s17   ;;  %s848_s15 = smov %s713_s16 }
  0xfc   : > { %p11_p6 = scmp.ge.s32.totalorder %s14_s17, 4   ;;  %s849_s16 = smov %s851_s18 }
  0xfe   :  { %13 = sbr.rel (!%p11_p6) target bundleno = 2 (0x2), region = 72 }

// kernel: ahbf_se_forward.4
= control target key start
LH: loop header
LB: loop body
LE: loop exit
PB: predicated region body
PF: predicated region fallthrough
CT: control target
= control target key end

     0   :  { %s695_s17 = smov 64   ;;  %s931_s0 = inlined_call_operand.vmem [shape: f32[2,1,128], index: 0, kind: input, shape index: {}]   ;;  %s932_s1 = inlined_call_operand.vmem [shape: f32[2,1,128], index: 1, kind: input, shape index: {}]   ;;  %s933_s2 = inlined_call_operand.vmem [shape: f32[1,64], index: 2, kind: input, shape index: {}]   ;;  %s934_s3 = inlined_call_operand.vmem [shape: f32[1,64], index: 3, kind: input, shape index: {}]   ;;  %s935_s4 = inlined_call_operand.vmem [shape: f32[64,4], index: 4, kind: input, shape index: {}]   ;;  %s936_s5 = inlined_call_operand.vmem [shape: f32[4,64], index: 5, kind: input, shape index: {}]   ;;  %s937_s6 = inlined_call_operand.vmem [shape: f32[64,2], index: 6, kind: input, shape index: {}]   ;;  %s938_s7 = inlined_call_operand.vmem [shape: f32[1,2], index: 7, kind: input, shape index: {}]   ;;  %s939_s8 = inlined_call_operand.vmem [shape: f32[1,2], index: 8, kind: input, shape index: {}]   ;;  %s940_s9 = inlined_call_operand.vmem [shape: f32[1,2], index: 9, kind: input, shape index: {}]   ;;  %s941_s10 = inlined_call_operand.vmem [shape: f32[2,10], index: 10, kind: input, shape index: {}]   ;;  %s942_s11 = inlined_call_operand.vmem [shape: f32[2,10], index: 11, kind: input, shape index: {}]   ;;  %s943_s12 = inlined_call_operand.vmem [shape: f32[2,1,128], index: 12, kind: output, shape index: {0}]   ;;  %s944_s13 = inlined_call_operand.vmem [shape: f32[2,1,128], index: 13, kind: output, shape index: {1}]   ;;  %s945_s14 = inlined_call_operand.hbm [shape: f32[2,10], index: 14, kind: output, shape index: {2}]  }
   0x1   :  { %v57_v0 = vld [vmem:[%s932_s1] sm:$0x1]  ;;  %v58_v2 = vld [vmem:[%s932_s1 + $0x1] sm:$0x1] }
   0x2   :  { %v45_v1 = vld [vmem:[%s931_s0] sm:$0x1]  ;;  %61 = vrot.lane.b32.xlu1 %v57_v0, %s695_s17  ;;  %v46_v3 = vld [vmem:[%s931_s0 + $0x1] sm:$0x1] }
   0x3   :  { %49 = vrot.lane.b32.xlu0 %v45_v1, %s695_s17 }
   0x4   :  { %20 = vsyncpa [#allocation3], 0  ;;  %v172_v4 = vld [vmem:[%s935_s4 + $0x38] sm:$0xff]  ;;  %v696_v5 = vmov 0.0   ;;  %v171_v6 = vld [vmem:[%s935_s4 + $0x30] sm:$0xff]  ;;  %vm697_vm0 = vmmov 0   ;;  %v75_v15 = vlaneseq }
   0x5   :  { %608 = vmatprep.subr.mxu0 %v696_v5  ;;  %624 = vmatprep.mubr.msk.f32.mxu0 %vm697_vm0, %v696_v5  ;;  %v170_v7 = vld [vmem:[%s935_s4 + $0x28] sm:$0xff]  ;;  %v169_v8 = vld [vmem:[%s935_s4 + $0x20] sm:$0xff]  ;;  %v168_v9 = vld [vmem:[%s935_s4 + $0x18] sm:$0xff]  ;;  %v698_v13 = vmov 1966171168   ;;  %vm87_vm1 = vcmask 517120  }
   0x6   :  { %63 = vrot.lane.b32.xlu1 %v58_v2, %s695_s17  ;;  %609 = vmatpush3.msra.mxu0 %v172_v4  ;;  %v167_v10 = vld [vmem:[%s935_s4 + $0x10] sm:$0xff]  ;;  %v166_v11 = vld [vmem:[%s935_s4 + $0x8] sm:$0xff]  ;;  %v165_v12 = vld [vmem:[%s935_s4] sm:$0xff]  ;;  %v73_v14 = vunpack.c.l.s4 %v698_v13  ;;  %v76_v19 = vshrl.u32 %v75_v15, 7  ;;  %vm173_vm2 = vcmask 523264   ;;  %vm253_vm3 = vcmask 1043456  }
   0x7   :  { %51 = vrot.lane.b32.xlu0 %v46_v3, %s695_s17  ;;  %627 = vmatprep.subr.mxu1 %v696_v5  ;;  %v124_v55 = vld [vmem:[%s933_s2] sm:$0x1]  ;;  %vm249_vm4 = vcmask 31744   ;;  %v337_v13 = vld [vmem:[%s937_s6 + $0x18] sm:$0xff]  ;;  %v335_v15 = vld [vmem:[%s937_s6 + $0x8] sm:$0xff]  ;;  %vm422_vm5 = vcmask 9216  }
   0x8   :  { %610 = vmatprep.subr.mxu0 %v696_v5  ;;  %629 = vmatprep.mubr.msk.f32.mxu1 %vm697_vm0, %v696_v5  ;;  %v74_v18 = vunpack.c.0.s8 %v73_v14  ;;  %v136_v56 = vsub.s32 0, %v76_v19  ;;  %v128_v60 = vld [vmem:[%s934_s3] sm:$0x1]  ;;  %v336_v14 = vld [vmem:[%s937_s6 + $0x10] sm:$0xff]  ;;  %s701_s25 = smov [#allocation2]   ;;  %vm487_vm6 = vcmask 74752  }
   0x9   :  { %611 = vmatpush3.msra.mxu0 %v171_v6  ;;  %v248_v4 = vld [vmem:[%s936_s5] sm:$0xf]  ;;  %s565_s0 = sshll.u32 %s701_s25, 4  ;;  %s566_s0 = int_to_ptr.vmem [resolvable:$true] %s565_s0 }
   0xa   :  { %612 = vmatprep.subr.mxu0 %v696_v5  ;;  %v830_v20 = vsub.s32 %v74_v18, %v76_v19  ;;  %628 = vmatpush3.msk.msra.mxu1 %vm253_vm3, %v248_v4  ;;  %p678_p1 = scmp.lt.s32.totalorder %s566_s0, %s566_s0 }
   0xb   :  { %613 = vmatpush3.msra.mxu0 %v170_v7  ;;  %632 = vmatprep.subr.mxu1 %v696_v5 }
   0xc   :  { %614 = vmatprep.subr.mxu0 %v696_v5 }
   0xd   :  { %615 = vmatpush3.msra.mxu0 %v169_v8 }
   0xe   :  { %616 = vmatprep.subr.mxu0 %v696_v5 }
   0xf   :  { %617 = vmatpush3.msra.mxu0 %v168_v9  ;;  %v341_v9 = vld [vmem:[%s937_s6 + $0x38] sm:$0xff] }
  0x10   :  { %618 = vmatprep.subr.mxu0 %v696_v5 }
  0x11   :  { %619 = vmatpush3.msra.mxu0 %v167_v10  ;;  %v340_v10 = vld [vmem:[%s937_s6 + $0x30] sm:$0xff] }
  0x12   :  { %620 = vmatprep.subr.mxu0 %v696_v5 }
  0x13   :  { %621 = vmatpush3.msra.mxu0 %v166_v11  ;;  %v339_v11 = vld [vmem:[%s937_s6 + $0x28] sm:$0xff] }
  0x14   :  { %622 = vmatprep.subr.mxu0 %v696_v5 }
  0x15   :  { %623 = vmatpush3.msra.mxu0 %v165_v12  ;;  %v338_v12 = vld [vmem:[%s937_s6 + $0x20] sm:$0xff] }
  0x74   :  { %v62_v16 = vpop.permute.xlu1 %61 }
  0x75   :  { %v50_v17 = vpop.permute.xlu0 %49  ;;  %v67_v23 = vadd.f32 %v62_v16, %v57_v0  ;;  %v334_v16 = vld [vmem:[%s937_s6] sm:$0xff] }
  0x76   :  { %v55_v24 = vadd.f32 %v50_v17, %v45_v1 }
  0x78   :  { %v64_v21 = vpop.permute.xlu1 %63  ;;  %v131_v53 = vmul.f32 0.015625, %v55_v24 }
  0x79   :  { %v52_v22 = vpop.permute.xlu0 %51  ;;  %v68_v25 = vadd.f32 %v64_v21, %v58_v2 }
  0x7a   :  { %v56_v26 = vadd.f32 %v52_v22, %v46_v3 }
  0x7b   :  { %v98_v27 = vcombine.low %v67_v23, %v68_v25 }
  0x7c   :  { %v71_v28 = vcombine.low %v55_v24, %v56_v26  ;;  %v132_v52 = vmul.f32 0.015625, %v56_v26  ;;  %v580_v26 = vld [vmem:[%s938_s7] ss:$0 sm:$0xff] }
  0x7d   :  { %v105_v29 = vrot.slane %v98_v27, %v830_v20 }
  0x7e   :  { %v78_v30 = vrot.slane %v71_v28, %v830_v20  ;;  %v141_v54 = vcombine.low %v131_v53, %v132_v52 }
  0x7f   :  { %v112_v31 = vrot.slane %v105_v29, %v830_v20 }
  0x80   :  { %v85_v32 = vrot.slane %v78_v30, %v830_v20  ;;  %v148_v58 = vrot.slane %v141_v54, %v830_v20 }
  0x81   :  { %v114_v33 = vsel %vm87_vm1, %v112_v31, 0.0 }
  0x82   :  { %v88_v34 = vsel %vm87_vm1, %v85_v32, 0.0  ;;  %v115_v35 = vrot.slane %v114_v33, 4  ;;  %v155_v63 = vrot.slane %v148_v58, %v830_v20 }
  0x83   :  { %v89_v36 = vrot.slane %v88_v34, 4 }
  0x84   :  { %v116_v37 = vadd.f32 %v115_v35, %v114_v33 }
  0x85   :  { %v90_v38 = vadd.f32 %v89_v36, %v88_v34 }
  0x86   :  { %v117_v39 = vrot.slane %v116_v37, 2 }
  0x87   :  { %v91_v40 = vrot.slane %v90_v38, 2 }
  0x88   :  { %v118_v41 = vadd.f32 %v117_v39, %v116_v37 }
  0x89   :  { %v92_v42 = vadd.f32 %v91_v40, %v90_v38 }
  0x8a   :  { %v119_v43 = vrot.slane %v118_v41, 1 }
  0x8b   :  { %v93_v44 = vrot.slane %v92_v42, 1 }
  0x8c   :  { %v120_v45 = vadd.f32 %v119_v43, %v118_v41 }
  0x8d   :  { %v94_v46 = vadd.f32 %v93_v44, %v92_v42 }
  0x8e   :  { %v121_v48 = vmul.f32 0.0078125, %v120_v45 }
  0x8f   :  { %v95_v47 = vmul.f32 0.0078125, %v94_v46 }
  0x91   :  { %v122_v49 = vmul.f32 %v95_v47, %v95_v47 }
  0x93   :  { %v123_v50 = vsub.f32 %v121_v48, %v122_v49  ;;  %v582_v48 = vld [vmem:[%s939_s8] ss:$0 sm:$0xff] }
  0x95   :  { %v125_v51 = vadd.f32 1e-05, %v123_v50 }
  0x97   :  { %661 = vrsqrt.f32 %v125_v51  ;;  %v583_v51 = vld [vmem:[%s940_s9] ss:$0 sm:$0xff] }
  0xa4   :  { %v662_v57 = vpop.eup %661 }
  0xa5   :  { %v127_v59 = vmul.f32 %v662_v57, %v124_v55 }
  0xa7   :  { %v129_v61 = vmul.f32 %v127_v59, %v95_v47  ;;  %v843_v62 = vrot.slane %v127_v59, %v136_v56 }
  0xa9   :  { %v130_v0 = vsub.f32 %v128_v60, %v129_v61  ;;  %v157_v1 = vmul.f32 %v155_v63, %v843_v62  ;;  %v699_v61 = vmov 1   ;;  %v700_v63 = vmov 0  }
  0xaa   :  { %659 = vset.pattern.permute.xlu1 %v699_v61  ;;  %658 = vset.pattern.permute.xlu0 %v700_v63 }
  0xab   :  { %v847_v2 = vrot.slane %v130_v0, %v136_v56 }
  0xad   :  { %v164_v3 = vadd.f32 %v847_v2, %v157_v1 }
  0xaf   :  { %625 = vmatmul.mubr.msk.f32.vlgmr.msra.gmra.mxu0 %vm173_vm2, %v164_v3 }
 0x16f   :  { %v243_v6 = vpop.f32.mrf.mxu0 }
 0x170   :  { %v247_v7 = vmax.f32 %v243_v6, 0.0 }
 0x171   :  { %v626_v8 = vpop.f32.mrf.mxu0 }
 0x172   :  { %630 = vmatmul.mubr.msk.f32.vlgmr.msra.gmra.mxu1 %vm249_vm4, %v247_v7  ;;  %v480_v7 = vld [vmem:[%s942_s11] sm:$0x3]  ;;  %s673_s11 = scalar_lea.vmem %s566_s0, 32 }
 0x173   :  { %648 = vmatprep.mubr.msk.f32.mxu1 %vm697_vm0, %v696_v5  ;;  %633 = vmatpush3.msra.mxu1 %v341_v9  ;;  %v473_v8 = vld [vmem:[%s941_s10] sm:$0x3]  ;;  %p674_p0 = scmp.ne.s32.totalorder %s566_s0, %s673_s11  ;;  %p679_p2 = scmp.lt.s32.totalorder %s673_s11, %s673_s11 }
 0x174   :  { %634 = vmatprep.subr.mxu1 %v696_v5 }
 0x175   :  { %635 = vmatpush3.msra.mxu1 %v340_v10  ;;  %p680_p3 = por %p679_p2, %p678_p1 }
 0x176   :  { %636 = vmatprep.subr.mxu1 %v696_v5 }
 0x177   :  { %637 = vmatpush3.msra.mxu1 %v339_v11  ;;  %p681_p4 = pnand %p680_p3, %p674_p0 }
 0x178   :  { %638 = vmatprep.subr.mxu1 %v696_v5 }
 0x179   :  { %639 = vmatpush3.msra.mxu1 %v338_v12 }
 0x17a   :  { %640 = vmatprep.subr.mxu1 %v696_v5 }
 0x17b   :  { %641 = vmatpush3.msra.mxu1 %v337_v13 }
 0x17c   :  { %642 = vmatprep.subr.mxu1 %v696_v5 }
 0x17d   :  { %643 = vmatpush3.msra.mxu1 %v336_v14 }
 0x17e   :  { %644 = vmatprep.subr.mxu1 %v696_v5 }
 0x17f   :  { %645 = vmatpush3.msra.mxu1 %v335_v15 }
 0x180   :  { %646 = vmatprep.subr.mxu1 %v696_v5 }
 0x181   :  { %647 = vmatpush3.msra.mxu1 %v334_v16 }
 0x232   :  { %v323_v17 = vpop.f32.mrf.mxu1 }
 0x233   :  { %v327_v18 = vsub.f32 0.0, %v323_v17 }
 0x234   :  { %v631_v19 = vpop.f32.mrf.mxu1 }
 0x235   :  { %v328_v21 = vmul.f32 1.442695, %v327_v18 }
 0x237   :  { %663 = vpow2.f32 %v328_v21 }
 0x244   :  { %v664_v22 = vpop.eup %663 }
 0x245   :  { %v330_v23 = vadd.f32 1.0, %v664_v22 }
 0x247   :  { %665 = vrcp.f32 %v330_v23 }
 0x254   :  { %v666_v24 = vpop.eup %665 }
 0x255   :  { %v333_v25 = vmul.f32 %v666_v24, %v164_v3  ;;  %v489_v4 = vmul.f32 %v666_v24, %v843_v62  ;;  %v490_v6 = vmul.f32 %v666_v24, %v847_v2 }
 0x257   :  { %649 = vmatmul.mubr.msk.f32.vlgmr.msra.gmra.mxu1 %vm173_vm2, %v333_v25 }
 0x317   :  { %v418_v27 = vpop.f32.mrf.mxu1 }
 0x318   :  { %v419_v5 = vadd.f32 %v580_v26, %v418_v27 }
 0x319   :  { %v650_v28 = vpop.f32.mrf.mxu1 }
 0x31a   :  { %v423_v29 = vsel %vm422_vm5, %v419_v5, 0.0 }
 0x31b   :  { %v424_v30 = vrot.slane %v423_v29, 4 }
 0x31d   :  { %v425_v31 = vadd.f32 %v424_v30, %v423_v29 }
 0x31f   :  { %v426_v32 = vrot.slane %v425_v31, 2 }
 0x321   :  { %v427_v33 = vadd.f32 %v426_v32, %v425_v31 }
 0x323   :  { %v428_v34 = vrot.slane %v427_v33, 1 }
 0x325   :  { %v429_v35 = vadd.f32 %v428_v34, %v427_v33 }
 0x327   :  { %v431_v36 = vmul.f32 0.5, %v429_v35 }
 0x329   :  { %v432_v37 = vsub.f32 %v419_v5, %v431_v36 }
 0x32b   :  { %v433_v38 = vmul.f32 %v432_v37, %v432_v37  ;;  %v449_v49 = vmul.f32 %v582_v48, %v432_v37 }
 0x32d   :  { %v434_v39 = vsel %vm422_vm5, %v433_v38, 0.0 }
 0x32e   :  { %v435_v40 = vrot.slane %v434_v39, 4 }
 0x330   :  { %v436_v41 = vadd.f32 %v435_v40, %v434_v39 }
 0x332   :  { %v437_v42 = vrot.slane %v436_v41, 2 }
 0x334   :  { %v438_v43 = vadd.f32 %v437_v42, %v436_v41 }
 0x336   :  { %v439_v44 = vrot.slane %v438_v43, 1 }
 0x338   :  { %v440_v45 = vadd.f32 %v439_v44, %v438_v43 }
 0x33a   :  { %v441_v46 = vmul.f32 0.5, %v440_v45 }
 0x33c   :  { %v450_v47 = vadd.f32 1e-05, %v441_v46 }
 0x33e   :  { %667 = vrsqrt.f32 %v450_v47 }
 0x34b   :  { %v668_v50 = vpop.eup %667 }
 0x34c   :  { %v452_v52 = vmul.f32 %v668_v50, %v449_v49 }
 0x34e   :  { %v460_v53 = vadd.f32 %v583_v51, %v452_v52 }
 0x350   :  { %v461_v54 = vmax.f32 %v460_v53, 0.0 }
 0x352   :  { %v462_v55 = vsel %vm422_vm5, %v461_v54, -inf }
 0x353   :  { %463 = vmax.xlane.f32.xlu0 %v462_v55 }
 0x3dc   :  { %v464_v56 = vpop.xlane.xlu0 %463 }
 0x3dd   :  { %v465_v57 = vsub.f32 %v461_v54, %v464_v56 }
 0x3df   :  { %v466_v58 = vmul.f32 1.442695, %v465_v57 }
 0x3e1   :  { %669 = vpow2.f32 %v466_v58 }
 0x3ee   :  { %v670_v59 = vpop.eup %669 }
 0x3ef   :  { %v468_v60 = vsel %vm422_vm5, %v670_v59, 0.0 }
 0x3f0   :  { %469 = vadd.xlane.f32.xlu1 %v468_v60 }
 0x479   :  { %v470_v0 = vpop.xlane.xlu1 %469 }
 0x47a   :  { %671 = vrcp.f32 %v470_v0 }
 0x487   :  { %v672_v1 = vpop.eup %671 }
 0x488   :  { %v472_v3 = vmul.f32 %v672_v1, %v670_v59 }
 0x48a   :  { %482 = vperm.xlu1 %659, %v472_v3   ;;  %476 = vperm.xlu0 %658, %v472_v3  }
 0x48e   :  { %492 = vrot.lane.b32.xlu1 %v489_v4, %s695_s17  ;;  %660 = vset.pattern.permute.xlu0 %v699_v61 }
 0x492   :  { %524 = vrot.lane.b32.xlu1 %v490_v6, %s695_s17 }
 0x505   :  { %v483_v9 = vpop.permute.xlu1 %482  ;;  %v477_v10 = vpop.permute.xlu0 %476 }
 0x506   :  { %v485_v62 = vmul.f32 %v483_v9, %v480_v7  ;;  %v479_v11 = vmul.f32 %v477_v10, %v473_v8 }
 0x508   :  { %v486_v12 = vadd.f32 %v485_v62, %v479_v11 }
 0x509   :  { %v493_v2 = vpop.permute.xlu1 %492 }
 0x50a   :  { %v495_v13 = vsel %vm173_vm2, %v489_v4, %v493_v2  ;;  %488 = vst.msk [vmem:[#allocation2] sm:$0x3] %vm487_vm6, %v486_v12 }
 0x50b   :  { %v503_v14 = vrot.slane %v495_v13, %v830_v20 }
 0x50c   :  { %684 = shalt.err (!%p681_p4)
}
 0x50d   :  { %568 = dma.vmem_to_hbm [thread:$0]  %s566_s0, 32, %s945_s14, [#allocation3]   ;;  %v504_v15 = vcombine.high %v503_v14, %v503_v14  ;;  %584 = vst.sshfl [vmem:[%s943_s12] sm:$0x1 pattern:$0x73625140] %v503_v14  ;;  %v525_v16 = vpop.permute.xlu1 %524 }
 0x50e   :  { %v527_v17 = vsel %vm173_vm2, %v490_v6, %v525_v16 }
 0x50f   :  { %585 = vst.sshfl [vmem:[%s943_s12 + $0x1] sm:$0x1 pattern:$0x73625140] %v504_v15  ;;  %v535_v18 = vrot.slane %v527_v17, %v830_v20 }
 0x511   :  { %v536_v19 = vcombine.high %v535_v18, %v535_v18  ;;  %586 = vst.sshfl [vmem:[%s944_s13] sm:$0x1 pattern:$0x73625140] %v535_v18 }
 0x513   :  { %587 = vst.sshfl [vmem:[%s944_s13 + $0x1] sm:$0x1 pattern:$0x73625140] %v536_v19 }
 0x514   :  { %693 = dma.done.wait [#allocation3], 32  }
 0x515   :  { %694 = vsyncadd [#allocation3], 4294967264 }
 0x516   :  { %576 = vsyncpa [#allocation3], 1 }

</bundles_post_ra>
